<compile_context>
chip_gen: v7x
topology: tpu7x:2x2x1
jax: 0.10.0
libtpu: 0.0.40
codegen_flags: <defaults>
</compile_context>

<pallas_src>
from functools import partial

import numpy as np
import jax
import jax.numpy as jnp
from jax.experimental import pallas as pl
from jax.experimental.pallas import tpu as pltpu

# ----------------------- model hyper-parameters -----------------------------
HIDDEN = 64            # RobertaConfig(hidden_size=64)
NUM_HEADS = 4          # RobertaConfig(num_attention_heads=4)
NUM_LAYERS = 2         # RobertaConfig(num_hidden_layers=2)
INTERMEDIATE = 3072    # RobertaConfig default intermediate_size
MAX_POS = 4096         # RobertaConfig(max_position_embeddings=4096)
ROBERTA_VOCAB = 50265  # RobertaConfig default vocab_size
PAD_TOKEN_ID = 1       # Roberta padding idx (for position ids)
LN_EPS = 1e-12

MASK_NEG = -1e30
VOCAB_TILE_MAX = 2048  # CTC vocab is streamed through VMEM in tiles this wide


# =============================== helpers =====================================

def _round_up(x, m):
    return ((x + m - 1) // m) * m


def _vmem_limit_bytes(estimate):
    """Clamp an explicit scoped-VMEM request to [32 MiB, 64 MiB] (v7x physical)."""
    return int(min(64 * 1024 * 1024, max(32 * 1024 * 1024, int(estimate))))


def _ln(x, g, b):
    """LayerNorm over the last axis (f32)."""
    mu = jnp.mean(x, axis=-1, keepdims=True)
    var = jnp.mean((x - mu) ** 2, axis=-1, keepdims=True)
    return (x - mu) * jax.lax.rsqrt(var + LN_EPS) * g + b


# ============ fused Roberta encoder + mean-pool + joint linear ===============
#
# One grid step = one batch element.  All weights are full-array blocks with
# constant index maps, so they stay resident in VMEM across the batch grid.

def _encoder_pool_kernel(lens_ref, emb_ref, eg_ref, eb_ref,
                         wqkv_ref, bqkv_ref, woh_ref, bo_ref, g1_ref, b1_ref,
                         wi_ref, bi_ref, wo2_ref, bo2_ref, g2_ref, b2_ref,
                         lw_ref, lb_ref, out_ref, *, layers, heads, scale):
    bidx = pl.program_id(0)
    length = lens_ref[bidx]

    x = emb_ref[0].astype(jnp.float32)                     # (S, D)
    seq, d = x.shape
    dh = d // heads

    # attention key bias (1, S) and pooling mask (S, 1), both from lens.
    key_iota = jax.lax.broadcasted_iota(jnp.int32, (1, seq), 1)
    attn_bias = jnp.where(key_iota < length, 0.0, MASK_NEG).astype(jnp.float32)
    row_iota = jax.lax.broadcasted_iota(jnp.int32, (seq, 1), 0)
    pool_mask = (row_iota < length).astype(jnp.float32)

    # embedding LayerNorm
    x = _ln(x, eg_ref[...], eb_ref[...])

    for li in range(layers):
        # ---------------- attention block ----------------
        qkv = jnp.dot(x.astype(jnp.bfloat16), wqkv_ref[li],
                      preferred_element_type=jnp.float32) + bqkv_ref[li]  # (S,3D)
        attn = jnp.zeros((seq, d), jnp.float32)
        for hh in range(heads):                            # static head loop
            q = qkv[:, hh * dh:(hh + 1) * dh]
            k = qkv[:, d + hh * dh:d + (hh + 1) * dh]
            v = qkv[:, 2 * d + hh * dh:2 * d + (hh + 1) * dh]
            # NOTE: one (S, S) f32 score matrix is live at a time (heads are
            # processed sequentially).  TODO(synk): key-axis (flash) tiling
            # would be needed for S approaching MAX_POS on v7x (64 MiB VMEM).
            s = jax.lax.dot_general(
                q.astype(jnp.bfloat16), k.astype(jnp.bfloat16),
                (((1,), (1,)), ((), ())),
                preferred_element_type=jnp.float32) * scale + attn_bias
            m = jnp.max(s, axis=-1, keepdims=True)
            p = jnp.exp(s - m)
            p = p * pl.reciprocal(jnp.sum(p, axis=-1, keepdims=True), approx=True)
            ctx = jnp.dot(p.astype(jnp.bfloat16), v.astype(jnp.bfloat16),
                          preferred_element_type=jnp.float32)           # (S, dh)
            # per-head accumulated output projection (avoids the lane concat)
            attn = attn + jnp.dot(ctx.astype(jnp.bfloat16),
                                  woh_ref[li * heads + hh],
                                  preferred_element_type=jnp.float32)   # (S, D)
        x = _ln(attn + bo_ref[li] + x, g1_ref[li], b1_ref[li])

        # ---------------- FFN block ----------------
        inter = jnp.dot(x.astype(jnp.bfloat16), wi_ref[li],
                        preferred_element_type=jnp.float32) + bi_ref[li]
        # TODO(synk): HF Roberta uses exact erf-GELU; tanh approximation kept
        # because erf has no guaranteed Mosaic lowering.
        inter = jax.nn.gelu(inter, approximate=True)
        y = jnp.dot(inter.astype(jnp.bfloat16), wo2_ref[li],
                    preferred_element_type=jnp.float32) + bo2_ref[li]
        x = _ln(y + x, g2_ref[li], b2_ref[li])

    # ------- masked mean pool over time + final joint Linear (fused) -------
    summed = jnp.sum(x * pool_mask, axis=0, keepdims=True)              # (1, D)
    inv_len = pl.reciprocal(
        jnp.maximum(jnp.sum(pool_mask, axis=0, keepdims=True), 1.0), approx=True)
    mean = summed * inv_len
    out_ref[0] = (jnp.dot(mean.astype(jnp.bfloat16), lw_ref[...],
                          preferred_element_type=jnp.float32) + lb_ref[...])


def pallas_roberta_pool_linear(rob, lin_w, lin_b, input_ids, input_lens):
    """input_ids: (B, S) i32, input_lens: (B,) i32 -> (B, Lout) f32."""
    bsz, seq = input_ids.shape
    d = HIDDEN
    dh = d // NUM_HEADS
    scale = 1.0 / float(np.sqrt(dh))
    lout = lin_w.shape[1]
    layers = NUM_LAYERS

    # ---- embeddings: gathers stay in XLA, sums feed the fused kernel ----
    pos_mask = (input_ids != PAD_TOKEN_ID).astype(jnp.int32)
    position_ids = jnp.cumsum(pos_mask, axis=1) * pos_mask + PAD_TOKEN_ID
    word = jnp.take(rob["word_emb"], input_ids, axis=0)
    pos = jnp.take(rob["pos_emb"], position_ids, axis=0)
    tok = rob["type_emb"][0][None, None, :]
    emb = (word + pos + tok).astype(jnp.float32)           # (B, S, D)

    # explicit scoped-VMEM budget: resident weights + per-batch activations
    w_bytes = (layers * (d * 3 * d + d * d + 2 * d * INTERMEDIATE) * 2
               + d * lout * 2)
    act_bytes = (seq * 3 * d * 4 + seq * seq * 4
                 + seq * INTERMEDIATE * 4 + 6 * seq * d * 4)
    vmem = _vmem_limit_bytes(2 * w_bytes + 2 * act_bytes + (2 << 20))

    def _const_spec(shape):
        nd = len(shape)
        return pl.BlockSpec(shape, lambda i, lens, _nd=nd: (0,) * _nd)

    out = pl.pallas_call(
        partial(_encoder_pool_kernel, layers=layers, heads=NUM_HEADS, scale=scale),
        out_shape=jax.ShapeDtypeStruct((bsz, 1, lout), jnp.float32),
        grid_spec=pltpu.PrefetchScalarGridSpec(
            num_scalar_prefetch=1,
            grid=(bsz,),
            in_specs=[
                pl.BlockSpec((1, seq, d), lambda i, lens: (i, 0, 0)),   # emb
                _const_spec((1, d)), _const_spec((1, d)),               # emb LN
                _const_spec((layers, d, 3 * d)),                        # wqkv
                _const_spec((layers, 1, 3 * d)),                        # bqkv
                _const_spec((layers * NUM_HEADS, dh, d)),               # wo (per head)
                _const_spec((layers, 1, d)),                            # bo
                _const_spec((layers, 1, d)), _const_spec((layers, 1, d)),  # LN1
                _const_spec((layers, d, INTERMEDIATE)),                 # wi
                _const_spec((layers, 1, INTERMEDIATE)),                 # bi
                _const_spec((layers, INTERMEDIATE, d)),                 # wo2
                _const_spec((layers, 1, d)),                            # bo2
                _const_spec((layers, 1, d)), _const_spec((layers, 1, d)),  # LN2
                _const_spec((d, lout)), _const_spec((1, lout)),         # joint lin
            ],
            out_specs=pl.BlockSpec((1, 1, lout), lambda i, lens: (i, 0, 0)),
        ),
        compiler_params=pltpu.CompilerParams(
            dimension_semantics=("parallel",),
            vmem_limit_bytes=vmem),
    )(input_lens.astype(jnp.int32), emb,
      rob["emb_ln_g"], rob["emb_ln_b"],
      rob["wqkv"], rob["bqkv"], rob["wo_h"], rob["bo"],
      rob["ln1_g"], rob["ln1_b"],
      rob["wi"], rob["bi"], rob["wo2"], rob["bo2"],
      rob["ln2_g"], rob["ln2_b"],
      lin_w, lin_b)
    return out.reshape(bsz, lout)


# ======== fused CTC head: streaming masked argmax + did mean-pool ============
#
# grid = (batch, vocab_tile); the vocab axis is a running-max reduction, so the
# full (T, V) logits are never materialized.  The did-token mask is folded into
# the bias host-side.

def _ctc_kernel(lens_ref, x_ref, w_ref, bm_ref, wdid_ref, bdid_ref,
                align_ref, did_ref, max_sc, arg_sc, *, vt_size):
    bidx = pl.program_id(0)
    vt = pl.program_id(1)
    last = pl.num_programs(1) - 1

    x = x_ref[0].astype(jnp.float32)                       # (T, D)
    xb = x.astype(jnp.bfloat16)
    t = x.shape[0]

    @pl.when(vt == 0)
    def _():
        max_sc[...] = jnp.full_like(max_sc, -jnp.inf)
        arg_sc[...] = jnp.zeros_like(arg_sc)
        # step-4 branch: ctc_lo(encoder_out)[:, :, did] + masked time mean-pool
        did = jnp.dot(xb, wdid_ref[...],
                      preferred_element_type=jnp.float32) + bdid_ref[...]  # (T, n)
        tmask = (jax.lax.broadcasted_iota(jnp.int32, (t, 1), 0)
                 < lens_ref[bidx]).astype(jnp.float32)
        summed = jnp.sum(did * tmask, axis=0, keepdims=True)
        inv_len = pl.reciprocal(
            jnp.maximum(jnp.sum(tmask, axis=0, keepdims=True), 1.0), approx=True)
        did_ref[0] = summed * inv_len

    # streaming masked argmax over this vocab tile (did/pad cols pre-masked in bias)
    logits = jnp.dot(xb, w_ref[...],
                     preferred_element_type=jnp.float32) + bm_ref[...]   # (T, VT)
    tile_max = jnp.max(logits, axis=-1, keepdims=True)                   # (T, 1)
    lane = jax.lax.broadcasted_iota(jnp.int32, logits.shape, 1) + vt * vt_size
    tile_arg = jnp.min(jnp.where(logits == tile_max, lane, jnp.int32(2 ** 30)),
                       axis=-1, keepdims=True)                           # (T, 1)
    better = tile_max > max_sc[...]   # ties keep the earlier (lower) index
    arg_sc[...] = jnp.where(better, tile_arg, arg_sc[...])
    max_sc[...] = jnp.where(better, tile_max, max_sc[...])

    @pl.when(vt == last)
    def _():
        align_ref[0] = arg_sc[...]


def pallas_ctc_fused(x, lens, ctc_w, ctc_b, ignore_did_tokens):
    """x: (B, T, D_enc) f32, lens: (B,) i32.

    Returns ctc_alignment (B, T, 1) i32 and time-mean-pooled did logits
    (B, 1, n_did) f32.
    """
    bsz, t, d = x.shape
    vocab = ctc_w.shape[1]
    n_did = len(ignore_did_tokens)

    # vocab tiling: pad the vocab up to a 128-multiple tile; padded columns are
    # masked out through the bias (which also carries the did-token mask).
    if vocab > VOCAB_TILE_MAX:
        vt_size = VOCAB_TILE_MAX
    else:
        vt_size = _round_up(max(vocab, 1), 128)
    vocab_p = _round_up(vocab, vt_size)
    n_vt = vocab_p // vt_size

    mask = np.zeros((1, vocab_p), np.float32)
    mask[0, list(ignore_did_tokens)] = MASK_NEG
    mask[0, vocab:] = MASK_NEG
    w_p = jnp.pad(ctc_w, ((0, 0), (0, vocab_p - vocab)))
    b_masked = jnp.pad(ctc_b, ((0, 0), (0, vocab_p - vocab))) + jnp.asarray(mask)

    did_idx = np.asarray(ignore_did_tokens, np.int32)
    w_did = ctc_w[:, did_idx]                              # (D_enc, n_did) bf16
    b_did = ctc_b[:, did_idx]                              # (1, n_did) f32

    vmem = _vmem_limit_bytes(2 * (d * vt_size * 2 + vt_size * 4)
                             + 4 * t * vt_size * 4
                             + 2 * t * d * 4 + (2 << 20))

    return pl.pallas_call(
        partial(_ctc_kernel, vt_size=vt_size),
        out_shape=(
            jax.ShapeDtypeStruct((bsz, t, 1), jnp.int32),
            jax.ShapeDtypeStruct((bsz, 1, n_did), jnp.float32),
        ),
        grid_spec=pltpu.PrefetchScalarGridSpec(
            num_scalar_prefetch=1,
            grid=(bsz, n_vt),
            in_specs=[
                pl.BlockSpec((1, t, d), lambda b, v, lens: (b, 0, 0)),
                pl.BlockSpec((d, vt_size), lambda b, v, lens: (0, v)),
                pl.BlockSpec((1, vt_size), lambda b, v, lens: (0, v)),
                pl.BlockSpec((d, n_did), lambda b, v, lens: (0, 0)),
                pl.BlockSpec((1, n_did), lambda b, v, lens: (0, 0)),
            ],
            out_specs=(
                pl.BlockSpec((1, t, 1), lambda b, v, lens: (b, 0, 0)),
                pl.BlockSpec((1, 1, n_did), lambda b, v, lens: (b, 0, 0)),
            ),
            scratch_shapes=[pltpu.VMEM((t, 1), jnp.float32),
                            pltpu.VMEM((t, 1), jnp.int32)],
        ),
        compiler_params=pltpu.CompilerParams(
            dimension_semantics=("parallel", "arbitrary"),
            vmem_limit_bytes=vmem),
    )(lens, x, w_p, b_masked, w_did, b_did)


# ======================= host-side text processing ==========================

def cvt_alignment_to_text(ctc_alignment, token_list):
    """Faithful port of RobertaJointModel.cvt_alignment_to_text (host Python)."""
    alignments = [[token_list[int(t)] for t in row] for row in ctc_alignment]
    ctc_text = []
    for alignment in alignments:
        words, current_word = [], []
        for token in alignment:
            if token in ["<blank>", "<unk>", "<sos/eos>"]:
                continue
            if token == "<space>":
                if current_word:
                    words.append("".join(current_word))
                    current_word = []
            else:
                current_word.append(token)
        if current_word:
            words.append("".join(current_word))
        ctc_text.append("<blank>" if not words else " ".join(words))
    return ctc_text


def synthetic_tokenize(text):
    # TODO(synk): `Tokenizer.from_file(tokenizer_pth)` (external HF tokenizer)
    # has no Pallas/JAX equivalent; replaced by a deterministic char-level map.
    return [3 + (ord(c) % 200) for c in text]


# ============================ parameter init =================================

def _lin_params(key, din, dout, w_dtype=jnp.bfloat16):
    kw, kb = jax.random.split(key)
    w = (jax.random.normal(kw, (din, dout), jnp.float32) * 0.02).astype(w_dtype)
    b = jax.random.normal(kb, (1, dout), jnp.float32) * 0.02
    return w, b


def init_params(key, d_enc, ctc_vocab, ln_out_dim):
    keys = jax.random.split(key, 8 + NUM_LAYERS)
    params = {}
    # CTC projection (ctc.ctc_lo : Linear(d_enc, vocab)) -- bf16 MXU weight
    params["ctc_w"], params["ctc_b"] = _lin_params(keys[0], d_enc, ctc_vocab)
    # Final joint projection (nn.Linear(64, ln_out_dim))
    params["lin_w"], params["lin_b"] = _lin_params(keys[1], HIDDEN, ln_out_dim)

    dh = HIDDEN // NUM_HEADS
    wqkv_l, bqkv_l, wo_l, bo_l = [], [], [], []
    wi_l, bi_l, wo2_l, bo2_l = [], [], [], []
    for li in range(NUM_LAYERS):
        lk = jax.random.split(keys[8 + li], 4)
        wqkv, bqkv = _lin_params(lk[0], HIDDEN, 3 * HIDDEN)   # fused Q|K|V
        wo, bo = _lin_params(lk[1], HIDDEN, HIDDEN)
        wi, bi = _lin_params(lk[2], HIDDEN, INTERMEDIATE)
        wo2, bo2 = _lin_params(lk[3], INTERMEDIATE, HIDDEN)
        wqkv_l.append(wqkv); bqkv_l.append(bqkv)
        wo_l.append(wo); bo_l.append(bo)
        wi_l.append(wi); bi_l.append(bi)
        wo2_l.append(wo2); bo2_l.append(bo2)

    # output projection pre-split per head: (L*H, dh, D); rows h*dh..(h+1)*dh of
    # the original (D, D) weight belong to head h of the concatenated context.
    wo_h = (jnp.stack(wo_l)
            .reshape(NUM_LAYERS, NUM_HEADS, dh, HIDDEN)
            .reshape(NUM_LAYERS * NUM_HEADS, dh, HIDDEN))

    rob = {
        "word_emb": jax.random.normal(keys[2], (ROBERTA_VOCAB, HIDDEN),
                                      jnp.float32) * 0.02,
        "pos_emb": jax.random.normal(keys[3], (MAX_POS, HIDDEN),
                                     jnp.float32) * 0.02,
        "type_emb": jax.random.normal(keys[4], (1, HIDDEN), jnp.float32) * 0.02,
        "emb_ln_g": jnp.ones((1, HIDDEN), jnp.float32),
        "emb_ln_b": jnp.zeros((1, HIDDEN), jnp.float32),
        "wqkv": jnp.stack(wqkv_l), "bqkv": jnp.stack(bqkv_l),
        "wo_h": wo_h, "bo": jnp.stack(bo_l),
        "ln1_g": jnp.ones((NUM_LAYERS, 1, HIDDEN), jnp.float32),
        "ln1_b": jnp.zeros((NUM_LAYERS, 1, HIDDEN), jnp.float32),
        "wi": jnp.stack(wi_l), "bi": jnp.stack(bi_l),
        "wo2": jnp.stack(wo2_l), "bo2": jnp.stack(bo2_l),
        "ln2_g": jnp.ones((NUM_LAYERS, 1, HIDDEN), jnp.float32),
        "ln2_b": jnp.zeros((NUM_LAYERS, 1, HIDDEN), jnp.float32),
    }
    params["roberta"] = rob
    return params


# ========================= RobertaJointModel.forward =========================

def roberta_joint_forward(params, encoder_out, encoder_out_lens,
                          token_list, ignore_did_tokens):
    bsz, t_enc, _ = encoder_out.shape
    n_did = len(ignore_did_tokens)

    # 1) fused ctc.argmax(encoder_out, ignored_tokens=...) + step-4 branch
    #    (did columns of ctc_lo, masked-mean-pooled over time).
    align, ctc_enc_out = pallas_ctc_fused(
        encoder_out.astype(jnp.float32), encoder_out_lens.astype(jnp.int32),
        params["ctc_w"], params["ctc_b"], ignore_did_tokens)

    # 2) alignment -> text -> token ids (host side, like the original module)
    ctc_alignment = np.asarray(align).reshape(bsz, t_enc)
    ctc_text = cvt_alignment_to_text(ctc_alignment, token_list)
    tokenized = [synthetic_tokenize(txt) for txt in ctc_text]
    s_rob = _round_up(max(len(tk) for tk in tokenized), 8)
    padded = np.zeros((bsz, s_rob), np.int32)        # pad_sequence padding_value=0
    for i, toks in enumerate(tokenized):
        padded[i, :len(toks)] = toks
    padded_lens = np.asarray([len(tk) for tk in tokenized], np.int32)

    # 3) fully fused Roberta encoder + masked mean-pool + joint Linear
    ctc_rob_out = pallas_roberta_pool_linear(
        params["roberta"], params["lin_w"], params["lin_b"],
        jnp.asarray(padded), jnp.asarray(padded_lens))

    # 4) concat with the pooled did logits (computed in the fused CTC kernel)
    return jnp.concatenate([ctc_rob_out, ctc_enc_out.reshape(bsz, n_did)],
                           axis=1)


# ================================== main =====================================

if __name__ == "__main__":
    # token list: blank/unk, 4 dialect-id tokens, letters, space, sos/eos
    token_list = (["<blank>", "<unk>", "<did_0>", "<did_1>", "<did_2>", "<did_3>"]
                  + list("abcdefgh") + ["<space>", "<sos/eos>"])
    ignore_did_tokens = [2, 3, 4, 5]
    ln_out_dim = 24

    B, T_ENC, D_ENC = 2, 16, 32
    key = jax.random.PRNGKey(0)
    k_param, k_enc = jax.random.split(key)

    params = init_params(k_param, D_ENC, len(token_list), ln_out_dim)

    encoder_out = jax.random.normal(k_enc, (B, T_ENC, D_ENC), jnp.float32)
    encoder_out_lens = jnp.array([16, 11], jnp.int32)

    out = roberta_joint_forward(params, encoder_out, encoder_out_lens,
                                token_list, ignore_did_tokens)
    out = jax.block_until_ready(out)
    assert out.shape == (B, ln_out_dim + len(ignore_did_tokens)), out.shape
    assert bool(jnp.all(jnp.isfinite(out)))
    print("KERNEL_OK")
</pallas_src>

<mosaic_0001>
module attributes {stable_mosaic.version = 11 : i64} {
  func.func @_ctc_kernel(%arg0: i32, %arg1: i32, %arg2: memref<2xi32, #tpu.memory_space<smem>>, %arg3: memref<1x16x32xf32, #tpu.memory_space<vmem>>, %arg4: memref<32x128xbf16, #tpu.memory_space<vmem>>, %arg5: memref<1x128xf32, #tpu.memory_space<vmem>>, %arg6: memref<32x4xbf16, #tpu.memory_space<vmem>>, %arg7: memref<1x4xf32, #tpu.memory_space<vmem>>, %arg8: memref<1x16x1xi32, #tpu.memory_space<vmem>>, %arg9: memref<1x1x4xf32, #tpu.memory_space<vmem>>, %arg10: memref<16x1xf32, #tpu.memory_space<vmem>>, %arg11: memref<16x1xi32, #tpu.memory_space<vmem>>) attributes {dimension_semantics = [#tpu.dimension_semantics<parallel>, #tpu.dimension_semantics<arbitrary>], iteration_bounds = array<i64: 2, 1>, scalar_prefetch = 1 : i64, scratch_operands = 2 : i64, tpu.core_type = #tpu.core_type<tc>, window_params = [{transform_indices = @transform_0, window_bounds = array<i64: 1, 16, 32>}, {transform_indices = @transform_1, window_bounds = array<i64: 32, 128>}, {transform_indices = @transform_2, window_bounds = array<i64: 1, 128>}, {pipeline_mode = #tpu.pipeline_mode<synchronous>, transform_indices = @transform_3, window_bounds = array<i64: 32, 4>}, {pipeline_mode = #tpu.pipeline_mode<synchronous>, transform_indices = @transform_4, window_bounds = array<i64: 1, 4>}, {transform_indices = @transform_5, window_bounds = array<i64: 1, 16, 1>}, {transform_indices = @transform_6, window_bounds = array<i64: 1, 1, 4>}]} {
    %c0 = arith.constant 0 : index
    %c0_0 = arith.constant 0 : index
    %c0_1 = arith.constant 0 : index
    %0 = vector.load %arg3[%c0, %c0_0, %c0_1] : memref<1x16x32xf32, #tpu.memory_space<vmem>>, vector<1x16x32xf32>
    %1 = vector.shape_cast %0 : vector<1x16x32xf32> to vector<16x32xf32>
    %2 = arith.truncf %1 : vector<16x32xf32> to vector<16x32xbf16>
    %c0_i32 = arith.constant 0 : i32
    %3 = arith.cmpi eq, %arg1, %c0_i32 : i32
    %4 = arith.extui %3 : i1 to i32
    %c0_i32_2 = arith.constant 0 : i32
    %5 = arith.cmpi ne, %4, %c0_i32_2 : i32
    scf.if %5 {
      %cst_21 = arith.constant 0xFF800000 : f32
      %34 = vector.broadcast %cst_21 : f32 to vector<16x1xf32>
      %c0_22 = arith.constant 0 : index
      %c0_23 = arith.constant 0 : index
      %35 = vector.load %arg10[%c0_22, %c0_23] : memref<16x1xf32, #tpu.memory_space<vmem>>, vector<16x1xf32>
      tpu.vector_store %arg10[%c0_22, %c0_23], %34 {strides = array<i32>} : memref<16x1xf32, #tpu.memory_space<vmem>>, vector<16x1xf32>,
      %c0_i32_24 = arith.constant 0 : i32
      %36 = vector.broadcast %c0_i32_24 : i32 to vector<16x1xi32>
      %c0_25 = arith.constant 0 : index
      %c0_26 = arith.constant 0 : index
      %37 = vector.load %arg11[%c0_25, %c0_26] : memref<16x1xi32, #tpu.memory_space<vmem>>, vector<16x1xi32>
      tpu.vector_store %arg11[%c0_25, %c0_26], %36 {strides = array<i32>} : memref<16x1xi32, #tpu.memory_space<vmem>>, vector<16x1xi32>,
      %c0_27 = arith.constant 0 : index
      %c0_28 = arith.constant 0 : index
      %38 = vector.load %arg6[%c0_27, %c0_28] : memref<32x4xbf16, #tpu.memory_space<vmem>>, vector<32x4xbf16>
      %cst_29 = arith.constant dense<0.000000e+00> : vector<16x4xf32>
      %39 = tpu.matmul %2, %38, %cst_29 {dimension_numbers = #tpu.dot_dimension_numbers<[1], [0], [0], [1], [0, 0, 1, 1], [], []>} : vector<16x32xbf16>, vector<32x4xbf16>, vector<16x4xf32> -> vector<16x4xf32>
      %c0_30 = arith.constant 0 : index
      %c0_31 = arith.constant 0 : index
      %40 = vector.load %arg7[%c0_30, %c0_31] : memref<1x4xf32, #tpu.memory_space<vmem>>, vector<1x4xf32>
      %41 = vector.broadcast %40 : vector<1x4xf32> to vector<16x4xf32>
      %42 = arith.addf %39, %41 : vector<16x4xf32>
      %43 = tpu.iota {dimensions = array<i32: 0>} : vector<16x1xi32>
      %44 = arith.index_cast %arg0 : i32 to index
      %45 = memref.load %arg2[%44] : memref<2xi32, #tpu.memory_space<smem>>
      %46 = vector.broadcast %45 : i32 to vector<16x1xi32>
      %47 = arith.cmpi slt, %43, %46 : vector<16x1xi32>
      %48 = arith.extui %47 : vector<16x1xi1> to vector<16x1xi32>
      %49 = arith.sitofp %48 : vector<16x1xi32> to vector<16x1xf32>
      %50 = vector.broadcast %49 : vector<16x1xf32> to vector<16x4xf32>
      %51 = arith.mulf %42, %50 : vector<16x4xf32>
      %cst_32 = arith.constant dense<0.000000e+00> : vector<4xf32>
      %52 = vector.multi_reduction <add>, %51, %cst_32 [0] : vector<16x4xf32> to vector<4xf32>
      %53 = vector.shape_cast %52 : vector<4xf32> to vector<1x4xf32>
      %cst_33 = arith.constant dense<0.000000e+00> : vector<1xf32>
      %54 = vector.multi_reduction <add>, %49, %cst_33 [0] : vector<16x1xf32> to vector<1xf32>
      %55 = vector.shape_cast %54 : vector<1xf32> to vector<1x1xf32>
      %cst_34 = arith.constant 1.000000e+00 : f32
      %56 = vector.broadcast %cst_34 : f32 to vector<1x1xf32>
      %57 = arith.maximumf %55, %56 : vector<1x1xf32>
      %58 = tpu.reciprocal %57 {approx = true} : vector<1x1xf32> -> vector<1x1xf32>
      %59 = vector.broadcast %58 : vector<1x1xf32> to vector<1x4xf32>
      %60 = arith.mulf %53, %59 : vector<1x4xf32>
      %c0_35 = arith.constant 0 : index
      %c0_36 = arith.constant 0 : index
      %c0_37 = arith.constant 0 : index
      %61 = vector.load %arg9[%c0_35, %c0_36, %c0_37] : memref<1x1x4xf32, #tpu.memory_space<vmem>>, vector<1x1x4xf32>
      %62 = vector.shape_cast %61 : vector<1x1x4xf32> to vector<1x4xf32>
      %63 = vector.shape_cast %60 : vector<1x4xf32> to vector<1x1x4xf32>
      tpu.vector_store %arg9[%c0_35, %c0_36, %c0_37], %63 {strides = array<i32>} : memref<1x1x4xf32, #tpu.memory_space<vmem>>, vector<1x1x4xf32>,
    } else {
    }
    %c0_3 = arith.constant 0 : index
    %c0_4 = arith.constant 0 : index
    %6 = vector.load %arg4[%c0_3, %c0_4] : memref<32x128xbf16, #tpu.memory_space<vmem>>, vector<32x128xbf16>
    %cst = arith.constant dense<0.000000e+00> : vector<16x128xf32>
    %7 = tpu.matmul %2, %6, %cst {dimension_numbers = #tpu.dot_dimension_numbers<[1], [0], [0], [1], [0, 0, 1, 1], [], []>} : vector<16x32xbf16>, vector<32x128xbf16>, vector<16x128xf32> -> vector<16x128xf32>
    %c0_5 = arith.constant 0 : index
    %c0_6 = arith.constant 0 : index
    %8 = vector.load %arg5[%c0_5, %c0_6] : memref<1x128xf32, #tpu.memory_space<vmem>>, vector<1x128xf32>
    %9 = vector.broadcast %8 : vector<1x128xf32> to vector<16x128xf32>
    %10 = arith.addf %7, %9 : vector<16x128xf32>
    %cst_7 = arith.constant dense<0xFF800000> : vector<16xf32>
    %11 = vector.multi_reduction <maximumf>, %10, %cst_7 [1] : vector<16x128xf32> to vector<16xf32>
    %12 = vector.shape_cast %11 : vector<16xf32> to vector<16x1xf32>
    %13 = tpu.iota {dimensions = array<i32: 1>} : vector<16x128xi32>
    %c128_i32 = arith.constant 128 : i32
    %14 = arith.muli %arg1, %c128_i32 : i32
    %15 = vector.broadcast %14 : i32 to vector<16x128xi32>
    %16 = arith.addi %13, %15 : vector<16x128xi32>
    %17 = vector.broadcast %12 : vector<16x1xf32> to vector<16x128xf32>
    %18 = arith.cmpf oeq, %10, %17 : vector<16x128xf32>
    %c1073741824_i32 = arith.constant 1073741824 : i32
    %19 = vector.broadcast %c1073741824_i32 : i32 to vector<16x128xi32>
    %20 = arith.select %18, %16, %19 : vector<16x128xi1>, vector<16x128xi32>
    %cst_8 = arith.constant dense<2147483647> : vector<16xi32>
    %21 = vector.multi_reduction <minsi>, %20, %cst_8 [1] : vector<16x128xi32> to vector<16xi32>
    %22 = vector.shape_cast %21 : vector<16xi32> to vector<16x1xi32>
    %c0_9 = arith.constant 0 : index
    %c0_10 = arith.constant 0 : index
    %23 = vector.load %arg10[%c0_9, %c0_10] : memref<16x1xf32, #tpu.memory_space<vmem>>, vector<16x1xf32>
    %24 = arith.cmpf ogt, %12, %23 : vector<16x1xf32>
    %c0_11 = arith.constant 0 : index
    %c0_12 = arith.constant 0 : index
    %25 = vector.load %arg11[%c0_11, %c0_12] : memref<16x1xi32, #tpu.memory_space<vmem>>, vector<16x1xi32>
    %26 = arith.select %24, %22, %25 : vector<16x1xi1>, vector<16x1xi32>
    %c0_13 = arith.constant 0 : index
    %c0_14 = arith.constant 0 : index
    %27 = vector.load %arg11[%c0_13, %c0_14] : memref<16x1xi32, #tpu.memory_space<vmem>>, vector<16x1xi32>
    tpu.vector_store %arg11[%c0_13, %c0_14], %26 {strides = array<i32>} : memref<16x1xi32, #tpu.memory_space<vmem>>, vector<16x1xi32>,
    %c0_15 = arith.constant 0 : index
    %c0_16 = arith.constant 0 : index
    %28 = vector.load %arg10[%c0_15, %c0_16] : memref<16x1xf32, #tpu.memory_space<vmem>>, vector<16x1xf32>
    %29 = arith.select %24, %12, %28 : vector<16x1xi1>, vector<16x1xf32>
    %c0_17 = arith.constant 0 : index
    %c0_18 = arith.constant 0 : index
    %30 = vector.load %arg10[%c0_17, %c0_18] : memref<16x1xf32, #tpu.memory_space<vmem>>, vector<16x1xf32>
    tpu.vector_store %arg10[%c0_17, %c0_18], %29 {strides = array<i32>} : memref<16x1xf32, #tpu.memory_space<vmem>>, vector<16x1xf32>,
    %c0_i32_19 = arith.constant 0 : i32
    %31 = arith.cmpi eq, %arg1, %c0_i32_19 : i32
    %32 = arith.extui %31 : i1 to i32
    %c0_i32_20 = arith.constant 0 : i32
    %33 = arith.cmpi ne, %32, %c0_i32_20 : i32
    scf.if %33 {
      %c0_21 = arith.constant 0 : index
      %c0_22 = arith.constant 0 : index
      %34 = vector.load %arg11[%c0_21, %c0_22] : memref<16x1xi32, #tpu.memory_space<vmem>>, vector<16x1xi32>
      %c0_23 = arith.constant 0 : index
      %c0_24 = arith.constant 0 : index
      %c0_25 = arith.constant 0 : index
      %35 = vector.load %arg8[%c0_23, %c0_24, %c0_25] : memref<1x16x1xi32, #tpu.memory_space<vmem>>, vector<1x16x1xi32>
      %36 = vector.shape_cast %35 : vector<1x16x1xi32> to vector<16x1xi32>
      %37 = vector.shape_cast %34 : vector<16x1xi32> to vector<1x16x1xi32>
      tpu.vector_store %arg8[%c0_23, %c0_24, %c0_25], %37 {strides = array<i32>} : memref<1x16x1xi32, #tpu.memory_space<vmem>>, vector<1x16x1xi32>,
    } else {
    }
    return
  }
  func.func @transform_0(%arg0: i32, %arg1: i32, %arg2: memref<2xi32, #tpu.memory_space<smem>>) -> (i32, i32, i32) {
    %c0_i32 = arith.constant 0 : i32
    %c0_i32_0 = arith.constant 0 : i32
    %c0_i32_1 = arith.constant 0 : i32
    return %arg0, %c0_i32, %c0_i32_0 : i32, i32, i32
  }
  func.func @transform_1(%arg0: i32, %arg1: i32, %arg2: memref<2xi32, #tpu.memory_space<smem>>) -> (i32, i32) {
    %c0_i32 = arith.constant 0 : i32
    %c0_i32_0 = arith.constant 0 : i32
    return %c0_i32, %arg1 : i32, i32
  }
  func.func @transform_2(%arg0: i32, %arg1: i32, %arg2: memref<2xi32, #tpu.memory_space<smem>>) -> (i32, i32) {
    %c0_i32 = arith.constant 0 : i32
    %c0_i32_0 = arith.constant 0 : i32
    return %c0_i32, %arg1 : i32, i32
  }
  func.func @transform_3(%arg0: i32, %arg1: i32, %arg2: memref<2xi32, #tpu.memory_space<smem>>) -> (i32, i32) {
    %c0_i32 = arith.constant 0 : i32
    %c0_i32_0 = arith.constant 0 : i32
    %c0_i32_1 = arith.constant 0 : i32
    return %c0_i32, %c0_i32_0 : i32, i32
  }
  func.func @transform_4(%arg0: i32, %arg1: i32, %arg2: memref<2xi32, #tpu.memory_space<smem>>) -> (i32, i32) {
    %c0_i32 = arith.constant 0 : i32
    %c0_i32_0 = arith.constant 0 : i32
    %c0_i32_1 = arith.constant 0 : i32
    return %c0_i32, %c0_i32_0 : i32, i32
  }
  func.func @transform_5(%arg0: i32, %arg1: i32, %arg2: memref<2xi32, #tpu.memory_space<smem>>) -> (i32, i32, i32) {
    %c0_i32 = arith.constant 0 : i32
    %c0_i32_0 = arith.constant 0 : i32
    %c0_i32_1 = arith.constant 0 : i32
    return %arg0, %c0_i32, %c0_i32_0 : i32, i32, i32
  }
  func.func @transform_6(%arg0: i32, %arg1: i32, %arg2: memref<2xi32, #tpu.memory_space<smem>>) -> (i32, i32, i32) {
    %c0_i32 = arith.constant 0 : i32
    %c0_i32_0 = arith.constant 0 : i32
    %c0_i32_1 = arith.constant 0 : i32
    return %arg0, %c0_i32, %c0_i32_0 : i32, i32, i32
  }
}

</mosaic_0001>

<bundles_post_ra>
// kernel: tpu_custom_call.1
= control target key start
LH: loop header
LB: loop body
LE: loop exit
PB: predicated region body
PF: predicated region fallthrough
CT: control target
= control target key end

     0   :  { %s1275_s0 = inlined_call_operand.vmem [shape: s32[2], index: 0, kind: input, shape index: {}]   ;;  %s1276_s1 = inlined_call_operand.hbm [shape: f32[2,16,32], index: 1, kind: input, shape index: {}]   ;;  %s1277_s2 = inlined_call_operand.vmem [shape: bf16[32,128], index: 2, kind: input, shape index: {}]   ;;  %s1278_s3 = inlined_call_operand.vmem [shape: f32[1,128], index: 3, kind: input, shape index: {}]   ;;  %s1279_s4 = inlined_call_operand.vmem [shape: bf16[32,4], index: 4, kind: input, shape index: {}]   ;;  %s1280_s5 = inlined_call_operand.vmem [shape: f32[1,4], index: 5, kind: input, shape index: {}]   ;;  %s1281_s6 = inlined_call_operand.vmem [shape: s32[2,16,1], index: 6, kind: output, shape index: {0}]   ;;  %s1282_s7 = inlined_call_operand.hbm [shape: f32[2,1,4], index: 7, kind: output, shape index: {1}]  }
   0x1   :  { %s13_s26 = sshll.u32 %s1275_s0, 4  ;;  %s14_s26 = int_to_ptr.vmem [resolvable:$true] %s13_s26 }
   0x2   :  { %s853_s27 = scalar_lea.vmem %s14_s26, 16  ;;  %p858_p1 = scmp.lt.s32.totalorder %s14_s26, %s14_s26 }
   0x3   :  { %p854_p0 = scmp.ne.s32.totalorder %s14_s26, %s853_s27  ;;  %p859_p2 = scmp.lt.s32.totalorder %s853_s27, %s853_s27 }
   0x5   :  { %p860_p3 = por %p859_p2, %p858_p1 }
   0x7   :  { %p861_p4 = pnand %p860_p3, %p854_p0 }
   0x9   :  { %864 = shalt.err (!%p861_p4)  }
   0xa   :  { %s981_s28 = smov [#allocation5]  }
   0xb   :  { %16 = dma.vmem_to_smem %s14_s26, 16, %s981_s28, [#allocation4] }
   0xc   :  { %947 = dma.done.wait [#allocation4], 16 }
   0xd   :  { %948 = vsyncadd [#allocation4], 4294967280 }
   0xe   :  { %18 = sfence }
   0xf   :  { %19 = vsyncpa [#allocation7], 0 }
  0x10   :  { %21 = vsyncpa [#allocation7 + $0x1], 0 }
  0x11   :  { %22 = vsyncpa [#allocation8], 0 }
  0x12   :  { %24 = vsyncpa [#allocation8 + $0x1], 0  ;;  %s1033_s29 = smov 0   ;;  %s1035_s0 = smov 0  }
  0x13   :  { %s1037_s30 = smov 0   ;;  %s1039_s8 = smov 0  }
  0x14   :  { %s1041_s9 = smov 0   ;;  %s1043_s10 = smov 0  }
  0x15 LB: > { %s728_s11 = sadd.s32 4294967295, %s979_s10   ;;  %s729_s12 = sadd.s32 4294967294, %s979_s10   ;;  %s979_s10 = sphi %s1043_s10, %s30_s10   ;;  %s975_s9 = sphi %s1041_s9, %s1297_s9   ;;  %s971_s8 = sphi %s1039_s8, %s1296_s8   ;;  %s967_s30 = sphi %s1037_s30, %s1295_s30   ;;  %s963_s0 = sphi %s1035_s0, %s1294_s0   ;;  %s959_s29 = sphi %s1033_s29, %s1293_s29  }
  0x16   : > { %s42_s13 = sadd.s32 1, %s975_s9  ;;  %s49_s14 = sadd.s32 1, %s967_s30 }
  0x17   : > { %p44_p5 = scmp.ge.s32.totalorder %s42_s13, 2  ;;  %p56_p6 = scmp.ne.s32.totalorder %s967_s30, %s963_s0 }
  0x18   : > { %p57_p7 = scmp.eq.s32.totalorder %s979_s10, 0  ;;  %p62_p8 = scmp.ne.s32.totalorder %s963_s0, %s959_s29 }
  0x19   : > { %s1299_s13 = smov (%p44_p5, %s42_s13), 0  ;;  %p63_p10 = scmp.eq.s32.totalorder %s728_s11, 0 }
  0x1a   : > { %p1074_p9 = por %p57_p7, %p56_p6  ;;  %s46_s16 = ssub.s32 %s975_s9, %s1299_s13 }
  0x1b   : > { %p206_p11 = scmp.eq.s32.totalorder %s728_s11, 1  ;;  %p47_p12 = scmp.eq.s32.totalorder %s46_s16, 0 }
  0x1c   : > { %p1080_p13 = por %p63_p10, %p62_p8  ;;  %p212_p1 = scmp.eq.s32.totalorder %s729_s12, 1 }
  0x1d   : > { %p1084_p0 = por %p206_p11, %p56_p6  ;;  %p790_p4 = scmp.lt.s32.totalorder %s979_s10, 2 }
  0x1e   : > { %s1089_s19 = scalar_select %p47_p12, %s967_s30, %s49_s14  }
  0x1f   : > { %s1286_s18 = scalar_select %p1084_p0, 1, 0 }
  0x20   : > { %p1091_p2 = por %p212_p1, %p62_p8  ;;  %s251_s21 = sand.u32 1, %s967_s30  }
  0x21   : > { %s734_s22 = sshll.u32 %s251_s21, 4  ;;  %s754_s23 = sshll.u32 %s975_s9, 8 }
  0x22   : > { %s1287_s20 = scalar_select %p1091_p2, 1, 0 }
  0x23   : > { %s1102_s26 = scalar_lea.hbm %s1276_s1, %s754_s23  ;;  %s255_s27 = scalar_lea.vmem [#allocation6], %s734_s22 }
  0x24   : > { %s262_s28 = sshll.u32 %s255_s27, 4  ;;  %p1108_p5 = pnand %p790_p4, %p1074_p9  ;;  %s1104_s28 = int_to_ptr.vmem [resolvable:$true] %s262_s28 }
  0x25   : > { %s1113_s12 = scalar_lea.sflag [#allocation7], %s251_s21  ;;  %s865_s14 = scalar_lea.hbm %s1102_s26, 256 }
  0x26   : > { %p866_p7 = scmp.ne.s32.totalorder %s1102_s26, %s865_s14  ;;  %p867_p8 = pneg %p1108_p5 }
  0x27   : > { %s870_s15 = scalar_lea.hbm %s1276_s1, 512  ;;  %p871_p9 = scmp.lt.u32.totalorder %s1102_s26, %s1276_s1 }
  0x28   : > { %p868_p10 = pnand %p867_p8, %p866_p7  ;;  %p872_p12 = scmp.lt.u32.totalorder %s870_s15, %s865_s14 }
  0x29   : > { %p874_p4 = scmp.lt.u32.totalorder %s865_s14, %s1102_s26 }
  0x2a   : > { %p869_p11 = pneg %p868_p10  ;;  %p873_p1 = por %p872_p12, %p871_p9 }
  0x2c   : > { %p875_p3 = por %p874_p4, %p873_p1 }
  0x2e   : > { %p876_p6 = pnand %p875_p3, %p869_p11 }
  0x30   : > { %879 = shalt.err (!%p876_p6)
}
  0x31   : > { %s880_s21 = scalar_lea.vmem %s1104_s28, 256  ;;  %s982_s25 = smov [#allocation6]  }
  0x32   : > { %p881_p7 = scmp.ne.s32.totalorder %s1104_s28, %s880_s21  ;;  %s885_s27 = sshll.u32 %s982_s25, 4  ;;  %s886_s27 = int_to_ptr.vmem [resolvable:$false] %s885_s27 }
  0x33   : > { %s887_s16 = scalar_lea.vmem %s886_s27, 512  ;;  %p888_p0 = scmp.lt.s32.totalorder %s1104_s28, %s886_s27 }
  0x34   : > { %p883_p10 = pnand %p881_p7, %p867_p8  ;;  %p889_p9 = scmp.lt.s32.totalorder %s887_s16, %s880_s21 }
  0x36   : > { %p884_p2 = pneg %p883_p10  ;;  %p890_p12 = por %p889_p9, %p888_p0 }
  0x38   : > { %p891_p1 = pnand %p890_p12, %p884_p2 }
  0x3a   : > { %894 = shalt.err (!%p891_p1)
}
  0x3b   : > { %s983_s14 = smov 128   ;;  %s984_s22 = smov 8  }
  0x3c   : > { %785 = dma.hbm_to_vmem [thread:$0]  (!%p1108_p5), %s1102_s26, 256, %s1104_s28, %s1113_s12, %s983_s14, %s983_s14, %s984_s22  }
  0x3d   : > { %p270_p3 = scmp.lt.s32.totalorder %s979_s10, 3  ;;  %p1289_p6 = scmp.ge.s32.totalorder %s979_s10, 1 }
  0x3f   : > { %p271_p8 = pnand %p1289_p6, %p270_p3 }
  0x40   : > { %s1145_s15 = sand.u32 (!%p271_p8), 1, %s963_s0  }
  0x41   : > { %274 = sbr.rel (%p271_p8) target bundleno = 749 (0x2ed), region = 40  ;;  %s738_s23 = sshll.u32 (!%p271_p8), %s1145_s15, 4 }
  0x42   : > { %s277_s24 = scalar_lea.sflag (!%p271_p8), [#allocation7], %s1145_s15  ;;  %s280_s21 = scalar_lea.vmem (!%p271_p8), [#allocation6], %s738_s23 }
  0x48   : > { %950 = dma.done.wait (%p1080_p13), %s277_s24, 256  }
  0x49   : > { %952 = vsyncadd (%p1080_p13), %s277_s24, 4294967040  ;;  %v985_v0 = vmov 0.0   ;;  %vm986_vm0 = vmmov 0   ;;  %v847_v1 = vld [vmem:[%s1277_s2] sm:$0xff]   ;;  %v848_v2 = vld [vmem:[%s1277_s2 + $0x8] sm:$0xff]   ;;  %vm368_vm1 = vcmask 261120   ;;  %v413_v16 = vlaneseq }
  0x4a   : > { %770 = vmatprep.subr.bf16.mxu1 %v985_v0  ;;  %774 = vmatprep.mubr.msk.bf16.mxu1 %vm986_vm0, %v985_v0  ;;  %v333_v3 = vld [vmem:[%s280_s21] sm:$0xff]  ;;  %v334_v4 = vld [vmem:[%s280_s21 + $0x8] sm:$0xff]  ;;  %vm340_vm2 = vcmask 7168   ;;  %v987_v6 = vmov -inf   ;;  %v988_v30 = vmov 0   ;;  %s416_s23 = sld [smem:[#allocation5 + %s971_s8]] }
  0x4b   : > { %762 = vmatprep.subr.bf16.mxu0 %v985_v0  ;;  %766 = vmatprep.mubr.msk.bf16.mxu0 %vm986_vm0, %v985_v0  ;;  %v335_v5 = vpack.c.bf16 %v334_v4, %v333_v3  ;;  %341 = vst.msk [vmem:[#allocation2] sm:$0xff] %vm340_vm2, %v987_v6  ;;  %342 = vst.msk [vmem:[#allocation2 + $0x8] sm:$0xff] %vm340_vm2, %v987_v6  ;;  %v747_v7 = vld [vmem:[%s1278_s3] ss:$0 sm:$0xff]  ;;  %v850_v15 = vld [vmem:[%s1279_s4 + $0x8] sm:$0xff]   ;;  %v521_v18 = vand.u32 127, %v413_v16 }
  0x4c   : > { %771 = vmatpush3.bf16.msra.mxu1 %v847_v1  ;;  %v849_v14 = vld [vmem:[%s1279_s4] sm:$0xff]   ;;  %343 = vst.msk [vmem:[#allocation3] sm:$0xff] %vm340_vm2, %v988_v30  ;;  %344 = vst.msk [vmem:[#allocation3 + $0x8] sm:$0xff] %vm340_vm2, %v988_v30  ;;  %v414_v31 = vshrl.u32 %v413_v16, 7  ;;  %vm426_vm9 = vcmask 31744   ;;  %vm446_vm12 = vcmask 24576  }
  0x4d   : > { %772 = vmatprep.subr.bf16.mxu1 %v985_v0  ;;  %763 = vmatpush3.bf16.msra.mxu0 %v849_v14  ;;  %v741_v34 = vld [vmem:[%s1280_s5] ss:$0 sm:$0xff]  ;;  %s319_s26 = scalar_lea.vmem [#allocation9], %s1145_s15  ;;  %s751_s28 = sshll.u32 %s971_s8, 4 }
  0x4e   : > { %764 = vmatprep.subr.bf16.mxu0 %v985_v0  ;;  %v415_v33 = vadd.s32 8, %v414_v31  ;;  %s602_s11 = sshll.u32 %s319_s26, 4  ;;  %s1217_s25 = scalar_lea.hbm %s1282_s7, %s751_s28  ;;  %s603_s11 = int_to_ptr.vmem [resolvable:$true] %s602_s11 }
  0x4f   : > { %s587_s27 = scalar_lea.sflag [#allocation8], %s1145_s15  ;;  %s895_s16 = scalar_lea.vmem %s603_s11, 16 }
  0x50   : > { %773 = vmatpush3.bf16.msra.mxu1 %v848_v2  ;;  %v417_v32 = vstv %s416_s23  ;;  %p896_p13 = scmp.ne.s32.totalorder %s603_s11, %s895_s16  ;;  %p1290_p0 = scmp.ne.s32.totalorder %s1286_s18, 0 }
  0x51   : > { %765 = vmatpush3.bf16.msra.mxu0 %v850_v15  ;;  %vm418_vm7 = vcmp.lt.s32.totalorder %v414_v31, %v417_v32  ;;  %vm419_vm8 = vcmp.lt.s32.totalorder %v415_v33, %v417_v32  ;;  %s989_s14 = smov [#allocation9]  }
  0x52   : > { %v1178_v17 = vld [vmem:[#allocation2] sm:$0xff]  ;;  %v1190_v21 = vld [vmem:[#allocation2 + $0x8] sm:$0xff]  ;;  %v745_v38 = vsel %vm418_vm7, 1.0, %v985_v0  ;;  %v746_v43 = vsel %vm419_vm8, 1.0, %v985_v0  ;;  %p897_p2 = pnand %p896_p13, %p1290_p0  ;;  %s899_s22 = sshll.u32 %s989_s14, 4  ;;  %s900_s22 = int_to_ptr.vmem [resolvable:$false] %s899_s22 }
  0x53   : > { %775 = vmatmul.mubr.msk.bf16.vlgmr.msra.gmra.mrb[0].mxu1 %vm368_vm1, %v335_v5  ;;  %v436_v48 = vadd.f32 %v746_v43, %v745_v38  ;;  %s901_s23 = scalar_lea.vmem %s900_s22, 32  ;;  %p902_p11 = scmp.lt.s32.totalorder %s603_s11, %s900_s22 }
  0x54   : > { %767 = vmatmul.mubr.msk.bf16.vlgmr.msra.gmra.mrb[0].mxu0 %vm368_vm1, %v335_v5  ;;  %p898_p5 = pneg %p897_p2  ;;  %p903_p4 = scmp.lt.s32.totalorder %s901_s23, %s895_s16 }
  0x55   : > { %v437_v49 = vrot.slane %v436_v48, 4 }
  0x56   : > { %p904_p7 = por %p903_p4, %p902_p11 }
  0x57   : > { %v438_v50 = vadd.f32 %v437_v49, %v436_v48 }
  0x58   : > { %p905_p10 = pnand %p904_p7, %p898_p5 }
  0x59   : > { %v439_v51 = vrot.slane %v438_v50, 2 }
  0x5b   : > { %v440_v52 = vadd.f32 %v439_v51, %v438_v50 }
  0x5d   : > { %v441_v54 = vrot.slane %v440_v52, 1 }
  0x5f   : > { %v442_v59 = vadd.f32 %v441_v54, %v440_v52 }
  0x61   : > { %v443_v0 = vmax.f32 %v442_v59, 1.0 }
  0x63   : > { %851 = vrcp.f32 %v443_v0 }
  0x6d   : > { %v852_v6 = vpop.eup %851 }
 0x126   : > { %v509_v8 = vpop.f32.mrb[0].mxu1 }
 0x127   : > { %v510_v9 = vadd.f32 %v747_v7, %v509_v8  ;;  %v776_v10 = vpop.f32.mrb[1].mxu1  ;;  %v406_v35 = vpop.f32.mrb[0].mxu0 }
 0x128   : > { %v512_v11 = vpop.f32.mrb[2].mxu1  ;;  %v407_v36 = vadd.f32 %v741_v34, %v406_v35  ;;  %v768_v37 = vpop.f32.mrb[1].mxu0 }
 0x129   : > { %516 = vmax.xlane.f32.xlu0 %v510_v9  ;;  %v777_v12 = vpop.f32.mrb[3].mxu1  ;;  %v513_v13 = vadd.f32 %v747_v7, %v512_v11  ;;  %v409_v39 = vpop.f32.mrb[2].mxu0 }
 0x12a   : > { %v424_v40 = vmul.f32 %v745_v38, %v407_v36  ;;  %v410_v41 = vadd.f32 %v741_v34, %v409_v39  ;;  %v769_v42 = vpop.f32.mrb[3].mxu0 }
 0x12c   : > { %v427_v44 = vsel %vm426_vm9, %v424_v40, 0.0  ;;  %v425_v45 = vmul.f32 %v746_v43, %v410_v41 }
 0x12d   : > { %518 = vmax.xlane.f32.xlu0 %v513_v13 }
 0x12e   : > { %v428_v46 = vsel %vm426_vm9, %v425_v45, 0.0 }
 0x12f   : > { %v429_v47 = vadd.f32 %v428_v46, %v427_v44 }
 0x131   : > { %v430_v55 = vrot.slane %v429_v47, 4 }
 0x133   : > { %v431_v60 = vadd.f32 %v430_v55, %v429_v47 }
 0x135   : > { %v432_v1 = vrot.slane %v431_v60, 2 }
 0x137   : > { %v433_v3 = vadd.f32 %v432_v1, %v431_v60 }
 0x139   : > { %v434_v4 = vrot.slane %v433_v3, 1 }
 0x13b   : > { %v435_v5 = vadd.f32 %v434_v4, %v433_v3 }
 0x13d   : > { %v445_v7 = vmul.f32 %v852_v6, %v435_v5 }
 0x13f   : > { %447 = vst.msk [vmem:[%s319_s26] sm:$0x1] %vm446_vm12, %v445_v7 }
 0x1b6   : > { %v1180_v19 = vpop.xlane.xlu0 %516 }
 0x1b7   : > { %vm525_vm3 = vcmp.eq.f32.partialorder %v510_v9, %v1180_v19  ;;  %vm559_vm4 = vcmp.gt.f32.partialorder %v1180_v19, %v1178_v17 }
 0x1b8   : > { %v570_v20 = vsel %vm559_vm4, %v1180_v19, %v1178_v17  ;;  %v527_v22 = vsel %vm525_vm3, %v521_v18, 1073741824 }
 0x1b9   : > { %572 = vst.msk [vmem:[#allocation2] sm:$0xff] %vm340_vm2, %v570_v20  ;;  %v530_v23 = vshra.s32 %v527_v22, 16  ;;  %v529_v53 = vand.u32 65535, %v527_v22 }
 0x1ba   : > { %v1193_v24 = vpop.xlane.xlu0 %518 }
 0x1bb   : > { %vm526_vm5 = vcmp.eq.f32.partialorder %v513_v13, %v1193_v24  ;;  %vm560_vm6 = vcmp.gt.f32.partialorder %v1193_v24, %v1190_v21  ;;  %v532_v25 = vcvt.s32.f32 %v530_v23  ;;  %v531_v57 = vcvt.s32.f32 %v529_v53 }
 0x1bc   : > { %v571_v26 = vsel %vm560_vm6, %v1193_v24, %v1190_v21  ;;  %v528_v27 = vsel %vm526_vm5, %v521_v18, 1073741824 }
 0x1bd   : > { %573 = vst.msk [vmem:[#allocation2 + $0x8] sm:$0xff] %vm340_vm2, %v571_v26  ;;  %533 = vmin.xlane.f32.xlu1 %v532_v25  ;;  %v544_v28 = vshra.s32 %v528_v27, 16  ;;  %v543_v58 = vand.u32 65535, %v528_v27 }
 0x1bf   : > { %v546_v29 = vcvt.s32.f32 %v544_v28  ;;  %v545_v63 = vcvt.s32.f32 %v543_v58 }
 0x1c1   : > { %547 = vmin.xlane.f32.xlu1 %v546_v29 }
 0x24a   : > { %v534_v56 = vpop.xlane.xlu1 %533 }
 0x24b   : > { %vm535_vm10 = vcmp.eq.f32.partialorder %v532_v25, %v534_v56 }
 0x24c   : > { %v536_v61 = vsel %vm535_vm10, %v531_v57, inf }
 0x24d   : > { %537 = vmin.xlane.f32.xlu0 %v536_v61 }
 0x24e   : > { %v548_v62 = vpop.xlane.xlu1 %547 }
 0x24f   : > { %vm549_vm11 = vcmp.eq.f32.partialorder %v546_v29, %v548_v62 }
 0x250   : > { %v550_v2 = vsel %vm549_vm11, %v545_v63, inf }
 0x251   : > { %551 = vmin.xlane.f32.xlu1 %v550_v2 }
 0x252   : > { %908 = shalt.err (!%p905_p10)
}
 0x253   : > { %s909_s15 = scalar_lea.hbm %s1217_s25, 16  ;;  %s913_s26 = scalar_lea.hbm %s1282_s7, 32 }
 0x254   : > { %p910_p9 = scmp.ne.s32.totalorder %s1217_s25, %s909_s15  ;;  %p914_p3 = scmp.lt.u32.totalorder %s1217_s25, %s1282_s7 }
 0x255   : > { %p915_p6 = scmp.lt.u32.totalorder %s913_s26, %s909_s15  ;;  %p917_p13 = scmp.lt.u32.totalorder %s909_s15, %s1217_s25 }
 0x256   : > { %p911_p12 = pnand %p910_p9, %p1290_p0 }
 0x257   : > { %p916_p8 = por %p915_p6, %p914_p3 }
 0x258   : > { %p912_p1 = pneg %p911_p12 }
 0x259   : > { %p918_p2 = por %p917_p13, %p916_p8 }
 0x25b   : > { %p919_p5 = pnand %p918_p2, %p912_p1 }
 0x25d   : > { %922 = shalt.err (!%p919_p5)
}
 0x25e   : > { %780 = dma.vmem_to_hbm [thread:$0]  (%p1290_p0), %s603_s11, 16, %s1217_s25, %s587_s27   ;;  %v540_v8 = vcvt.f32.s32 %v534_v56  ;;  %v554_v11 = vcvt.f32.s32 %v548_v62  ;;  %v561_v13 = vld [vmem:[#allocation3] sm:$0xff]  ;;  %v562_v22 = vld [vmem:[#allocation3 + $0x8] sm:$0xff] }
 0x25f   : > { %p327_p11 = scmp.lt.s32.totalorder %s971_s8, 1 }
 0x260   : > { %v541_v10 = vshll.u32 %v540_v8, 16  ;;  %v555_v16 = vshll.u32 %v554_v11, 16 }
 0x261   : > { %s1301_s8 = smov (!%p327_p11, %s971_s8), 1 }
 0x262   : > { %s755_s18 = sshll.u32 %s1301_s8, 4 }
 0x263   : > { %s331_s25 = scalar_lea.vmem %s1281_s6, %s755_s18 }
 0x2da   : > { %v538_v9 = vpop.xlane.xlu0 %537 }
 0x2db   : > { %v539_v12 = vcvt.f32.s32 %v538_v9 }
 0x2dd   : > { %v542_v14 = vadd.s32 %v541_v10, %v539_v12 }
 0x2de   : > { %v552_v15 = vpop.xlane.xlu1 %551 }
 0x2df   : > { %v563_v18 = vsel %vm559_vm4, %v542_v14, %v561_v13  ;;  %v553_v20 = vcvt.f32.s32 %v552_v15 }
 0x2e0   : > { %566 = vst.msk [vmem:[#allocation3] sm:$0xff] %vm340_vm2, %v563_v18 }
 0x2e1   : > { %v556_v23 = vadd.s32 %v555_v16, %v553_v20 }
 0x2e3   : > { %v564_v25 = vsel %vm560_vm6, %v556_v23, %v562_v22 }
 0x2e4   : > { %567 = vst.msk [vmem:[#allocation3 + $0x8] sm:$0xff] %vm340_vm2, %v564_v25 }
 0x2e7   : > { %v577_v26 = vld [vmem:[#allocation3] sm:$0xff] }
 0x2e8   : > { %579 = vst.msk [vmem:[%s331_s25] sm:$0xff] %vm340_vm2, %v577_v26 }
 0x2eb   : > { %v578_v17 = vld [vmem:[#allocation3 + $0x8] sm:$0xff] }
 0x2ec   : > { %580 = vst.msk [vmem:[%s331_s25 + $0x8] sm:$0xff] %vm340_vm2, %v578_v17 }
 0x2ed PF: > { %s622_s8 = sand.u32 1, %s959_s29   ;;  %p1291_p0 = scmp.ne.s32.totalorder %s1287_s20, 0 }
 0x2ee   : > { %p1292_p4 = scmp.ge.s32.totalorder %s979_s10, 2  ;;  %s623_s27 = scalar_lea.sflag [#allocation8], %s622_s8 }
 0x2f0   : > { %p787_p7 = pnand %p1292_p4, %p1291_p0 }
 0x2f2   : > { %954 = dma.done.wait (!%p787_p7), %s623_s27, 16  }
 0x2f3   : > { %956 = vsyncadd (!%p787_p7), %s623_s27, 4294967280  ;;  %s30_s10 = sadd.s32 1, %s979_s10   ;;  %s1293_s29 = smov %s963_s0 }
 0x2f4   : > { %p27_p10 = scmp.ge.s32.totalorder %s30_s10, 4   ;;  %s1294_s0 = smov %s967_s30 }
 0x2f5   : > { %s1295_s30 = smov %s1089_s19  ;;  %s1296_s8 = smov %s975_s9 }
 0x2f6   : > { %s1297_s9 = smov %s1299_s13  ;;  %29 = sbr.rel (!%p27_p10) target bundleno = 21 (0x15), region = 111 }
 0x2fd   :  { %627 = vsyncpa [#allocation7], 1 }
 0x2fe   :  { %629 = vsyncpa [#allocation7 + $0x1], 1 }
 0x2ff   :  { %630 = vsyncpa [#allocation8], 1 }
 0x300   :  { %632 = vsyncpa [#allocation8 + $0x1], 1 }

</bundles_post_ra>
